<compile_context>
chip_gen: v5e
topology: v5e:2x2
jax: 0.10.0
libtpu: 0.0.40
codegen_flags: <defaults>
</compile_context>

<pallas_src>
import functools

import jax
import jax.numpy as jnp
from jax import lax
from jax.experimental import pallas as pl
from jax.experimental.pallas import tpu as pltpu

HIDDEN = 256
LOG_STD_MIN = -20.0
LOG_STD_MAX = 2.0
EDGE = 0.003
MAX_TB = 512            # batch tile (rows per grid step), multiple of 8


def _round_up(x, m):
    return (x + m - 1) // m * m


def _policy_kernel(x_ref, w1_ref, b1_ref, w2_ref, b2_ref, wh_ref, bh_ref,
                   out_ref, *, action_dim):
    """One batch tile.

    x_ref   : (TB, S)        f32
    w1_ref  : (S, 256)       bf16   | b1_ref: (1, 256)      f32
    w2_ref  : (256, 256)     bf16   | b2_ref: (1, 256)      f32
    wh_ref  : (256, HEAD_PAD) bf16  | bh_ref: (1, HEAD_PAD) f32
    out_ref : (TB, HEAD_PAD) f32    (cols [0,A)=mean, [A,2A)=log_std, rest=pad)
    """
    # Layer 1: bf16 MXU operands, f32 accumulate, f32 elementwise.
    x = x_ref[...].astype(jnp.bfloat16)
    h1 = jnp.dot(x, w1_ref[...], preferred_element_type=jnp.float32) + b1_ref[...]
    h1 = jnp.maximum(h1, 0.0)

    # Layer 2.
    h2 = jnp.dot(h1.astype(jnp.bfloat16), w2_ref[...],
                 preferred_element_type=jnp.float32) + b2_ref[...]
    h2 = jnp.maximum(h2, 0.0)

    # Fused mean / log_std head (single lane-dense matmul + store).
    head = jnp.dot(h2.astype(jnp.bfloat16), wh_ref[...],
                   preferred_element_type=jnp.float32) + bh_ref[...]

    # Clamp applies only to the log_std columns [A, 2A).
    col = lax.broadcasted_iota(jnp.int32, head.shape, 1)
    is_log_std = (col >= action_dim) & (col < 2 * action_dim)
    head = jnp.where(is_log_std,
                     jnp.clip(head, LOG_STD_MIN, LOG_STD_MAX),
                     head)

    out_ref[...] = head.astype(out_ref.dtype)


@jax.jit
def policy_net_forward(state, params):
    """state: (B, state_dim) f32. params: dict mirroring PolicyNet layers
    (weights stored (in, out), biases (1, out))."""
    B, S = state.shape
    A = params["wm"].shape[1]
    head_pad = _round_up(2 * A, 128)          # lane-dense head output width

    # ---- pack / cast parameters (layout plumbing, fused into the jit) ----
    w1 = params["w1"].astype(jnp.bfloat16)
    w2 = params["w2"].astype(jnp.bfloat16)
    b1 = params["b1"].astype(jnp.float32)
    b2 = params["b2"].astype(jnp.float32)
    wh = jnp.concatenate([params["wm"], params["ws"]], axis=1)
    wh = jnp.pad(wh, ((0, 0), (0, head_pad - 2 * A))).astype(jnp.bfloat16)
    bh = jnp.concatenate([params["bm"], params["bs"]], axis=1)
    bh = jnp.pad(bh, ((0, 0), (0, head_pad - 2 * A))).astype(jnp.float32)

    # ---- batch tiling: TB multiple of 8 sublanes, pad B up to a tile ----
    TB = min(MAX_TB, _round_up(B, 8))
    B_pad = _round_up(B, TB)
    x = state.astype(jnp.float32)
    if B_pad != B:
        x = jnp.pad(x, ((0, B_pad - B), (0, 0)))
    grid = (B_pad // TB,)

    flops = 2 * B_pad * (S * HIDDEN + HIDDEN * HIDDEN + HIDDEN * head_pad)
    bytes_accessed = (x.size * 4
                      + (w1.size + w2.size + wh.size) * 2
                      + (b1.size + b2.size + bh.size) * 4
                      + B_pad * head_pad * 4)

    out = pl.pallas_call(
        functools.partial(_policy_kernel, action_dim=A),
        out_shape=jax.ShapeDtypeStruct((B_pad, head_pad), jnp.float32),
        grid=grid,
        in_specs=[
            pl.BlockSpec((TB, S), lambda i: (i, 0)),          # state tile
            pl.BlockSpec((S, HIDDEN), lambda i: (0, 0)),      # W1 (resident)
            pl.BlockSpec((1, HIDDEN), lambda i: (0, 0)),      # b1
            pl.BlockSpec((HIDDEN, HIDDEN), lambda i: (0, 0)), # W2 (resident)
            pl.BlockSpec((1, HIDDEN), lambda i: (0, 0)),      # b2
            pl.BlockSpec((HIDDEN, head_pad), lambda i: (0, 0)),  # fused head W
            pl.BlockSpec((1, head_pad), lambda i: (0, 0)),       # fused head b
        ],
        out_specs=pl.BlockSpec((TB, head_pad), lambda i: (i, 0)),
        compiler_params=pltpu.CompilerParams(
            dimension_semantics=("parallel",),
            vmem_limit_bytes=32 * 1024 * 1024),
        cost_estimate=pl.CostEstimate(
            flops=flops, transcendentals=0, bytes_accessed=bytes_accessed),
    )(x, w1, b1, w2, b2, wh, bh)

    out = out[:B]
    mean = out[:, :A]
    log_std = out[:, A:2 * A]
    return mean, log_std


def init_policy_params(key, state_dim, action_dim, edge=EDGE):
    """Mirrors PolicyNet.__init__: PyTorch default uniform(+-1/sqrt(fan_in))
    for the hidden layers, uniform(+-edge) for both heads."""
    k1, k2, k3, k4, k5, k6, k7, k8 = jax.random.split(key, 8)

    def linear(kw, kb, fan_in, fan_out, bound):
        w = jax.random.uniform(kw, (fan_in, fan_out), jnp.float32, -bound, bound)
        b = jax.random.uniform(kb, (1, fan_out), jnp.float32, -bound, bound)
        return w, b

    w1, b1 = linear(k1, k2, state_dim, HIDDEN, 1.0 / float(state_dim) ** 0.5)
    w2, b2 = linear(k3, k4, HIDDEN, HIDDEN, 1.0 / float(HIDDEN) ** 0.5)
    wm, bm = linear(k5, k6, HIDDEN, action_dim, edge)
    ws, bs = linear(k7, k8, HIDDEN, action_dim, edge)
    return {"w1": w1, "b1": b1, "w2": w2, "b2": b2,
            "wm": wm, "bm": bm, "ws": ws, "bs": bs}


def _reference_forward(state, p):
    """Pure-JAX reference with the same bf16-operand / f32-accumulate recipe."""
    x = state.astype(jnp.bfloat16)
    w1 = p["w1"].astype(jnp.bfloat16)
    w2 = p["w2"].astype(jnp.bfloat16)
    wm = p["wm"].astype(jnp.bfloat16)
    ws = p["ws"].astype(jnp.bfloat16)
    h1 = jnp.maximum(
        jnp.dot(x, w1, preferred_element_type=jnp.float32) + p["b1"], 0.0)
    h2 = jnp.maximum(
        jnp.dot(h1.astype(jnp.bfloat16), w2,
                preferred_element_type=jnp.float32) + p["b2"], 0.0)
    h2b = h2.astype(jnp.bfloat16)
    mean = jnp.dot(h2b, wm, preferred_element_type=jnp.float32) + p["bm"]
    log_std = jnp.dot(h2b, ws, preferred_element_type=jnp.float32) + p["bs"]
    log_std = jnp.clip(log_std, LOG_STD_MIN, LOG_STD_MAX)
    return mean, log_std


if __name__ == "__main__":
    key = jax.random.PRNGKey(0)
    k_param, k_state = jax.random.split(key)

    state_dim, action_dim = 16, 4
    params = init_policy_params(k_param, state_dim, action_dim)

    # Case 1: batch already a sublane multiple.
    state = jax.random.normal(k_state, (8, state_dim), jnp.float32)
    mean, log_std = policy_net_forward(state, params)
    jax.block_until_ready((mean, log_std))
    ref_mean, ref_log_std = _reference_forward(state, params)
    assert mean.shape == (8, action_dim) and log_std.shape == (8, action_dim)
    assert jnp.allclose(mean, ref_mean, atol=1e-4, rtol=1e-4)
    assert jnp.allclose(log_std, ref_log_std, atol=1e-4, rtol=1e-4)
    assert jnp.all(log_std >= LOG_STD_MIN) and jnp.all(log_std <= LOG_STD_MAX)

    # Case 2: ragged batch (exercises the pad-to-tile tail handling).
    state2 = jax.random.normal(jax.random.PRNGKey(1), (6, state_dim), jnp.float32)
    mean2, log_std2 = policy_net_forward(state2, params)
    jax.block_until_ready((mean2, log_std2))
    ref_mean2, ref_log_std2 = _reference_forward(state2, params)
    assert mean2.shape == (6, action_dim) and log_std2.shape == (6, action_dim)
    assert jnp.allclose(mean2, ref_mean2, atol=1e-4, rtol=1e-4)
    assert jnp.allclose(log_std2, ref_log_std2, atol=1e-4, rtol=1e-4)

    print("KERNEL_OK")
</pallas_src>

<mosaic_0001>
module attributes {stable_mosaic.version = 11 : i64} {
  func.func @_policy_kernel(%arg0: i32, %arg1: memref<8x16xf32, #tpu.memory_space<vmem>>, %arg2: memref<16x256xbf16, #tpu.memory_space<vmem>>, %arg3: memref<1x256xf32, #tpu.memory_space<vmem>>, %arg4: memref<256x256xbf16, #tpu.memory_space<vmem>>, %arg5: memref<1x256xf32, #tpu.memory_space<vmem>>, %arg6: memref<256x128xbf16, #tpu.memory_space<vmem>>, %arg7: memref<1x128xf32, #tpu.memory_space<vmem>>, %arg8: memref<8x128xf32, #tpu.memory_space<vmem>>) attributes {dimension_semantics = [#tpu.dimension_semantics<parallel>], iteration_bounds = array<i64: 1>, scalar_prefetch = 0 : i64, scratch_operands = 0 : i64, tpu.core_type = #tpu.core_type<tc>, window_params = [{transform_indices = @transform_0, window_bounds = array<i64: 8, 16>}, {pipeline_mode = #tpu.pipeline_mode<synchronous>, transform_indices = @transform_1, window_bounds = array<i64: 16, 256>}, {pipeline_mode = #tpu.pipeline_mode<synchronous>, transform_indices = @transform_2, window_bounds = array<i64: 1, 256>}, {pipeline_mode = #tpu.pipeline_mode<synchronous>, transform_indices = @transform_3, window_bounds = array<i64: 256, 256>}, {pipeline_mode = #tpu.pipeline_mode<synchronous>, transform_indices = @transform_4, window_bounds = array<i64: 1, 256>}, {pipeline_mode = #tpu.pipeline_mode<synchronous>, transform_indices = @transform_5, window_bounds = array<i64: 256, 128>}, {pipeline_mode = #tpu.pipeline_mode<synchronous>, transform_indices = @transform_6, window_bounds = array<i64: 1, 128>}, {transform_indices = @transform_7, window_bounds = array<i64: 8, 128>}]} {
    %c0 = arith.constant 0 : index
    %c0_0 = arith.constant 0 : index
    %0 = vector.load %arg1[%c0, %c0_0] : memref<8x16xf32, #tpu.memory_space<vmem>>, vector<8x16xf32>
    %1 = arith.truncf %0 : vector<8x16xf32> to vector<8x16xbf16>
    %c0_1 = arith.constant 0 : index
    %c0_2 = arith.constant 0 : index
    %2 = vector.load %arg2[%c0_1, %c0_2] : memref<16x256xbf16, #tpu.memory_space<vmem>>, vector<16x256xbf16>
    %cst = arith.constant dense<0.000000e+00> : vector<8x256xf32>
    %3 = tpu.matmul %1, %2, %cst {dimension_numbers = #tpu.dot_dimension_numbers<[1], [0], [0], [1], [0, 0, 1, 1], [], []>} : vector<8x16xbf16>, vector<16x256xbf16>, vector<8x256xf32> -> vector<8x256xf32>
    %c0_3 = arith.constant 0 : index
    %c0_4 = arith.constant 0 : index
    %4 = vector.load %arg3[%c0_3, %c0_4] : memref<1x256xf32, #tpu.memory_space<vmem>>, vector<1x256xf32>
    %5 = vector.broadcast %4 : vector<1x256xf32> to vector<8x256xf32>
    %6 = arith.addf %3, %5 : vector<8x256xf32>
    %cst_5 = arith.constant 0.000000e+00 : f32
    %7 = vector.broadcast %cst_5 : f32 to vector<8x256xf32>
    %8 = arith.maximumf %6, %7 : vector<8x256xf32>
    %9 = arith.truncf %8 : vector<8x256xf32> to vector<8x256xbf16>
    %c0_6 = arith.constant 0 : index
    %c0_7 = arith.constant 0 : index
    %10 = vector.load %arg4[%c0_6, %c0_7] : memref<256x256xbf16, #tpu.memory_space<vmem>>, vector<256x256xbf16>
    %cst_8 = arith.constant dense<0.000000e+00> : vector<8x256xf32>
    %11 = tpu.matmul %9, %10, %cst_8 {dimension_numbers = #tpu.dot_dimension_numbers<[1], [0], [0], [1], [0, 0, 1, 1], [], []>} : vector<8x256xbf16>, vector<256x256xbf16>, vector<8x256xf32> -> vector<8x256xf32>
    %c0_9 = arith.constant 0 : index
    %c0_10 = arith.constant 0 : index
    %12 = vector.load %arg5[%c0_9, %c0_10] : memref<1x256xf32, #tpu.memory_space<vmem>>, vector<1x256xf32>
    %13 = vector.broadcast %12 : vector<1x256xf32> to vector<8x256xf32>
    %14 = arith.addf %11, %13 : vector<8x256xf32>
    %cst_11 = arith.constant 0.000000e+00 : f32
    %15 = vector.broadcast %cst_11 : f32 to vector<8x256xf32>
    %16 = arith.maximumf %14, %15 : vector<8x256xf32>
    %17 = arith.truncf %16 : vector<8x256xf32> to vector<8x256xbf16>
    %c0_12 = arith.constant 0 : index
    %c0_13 = arith.constant 0 : index
    %18 = vector.load %arg6[%c0_12, %c0_13] : memref<256x128xbf16, #tpu.memory_space<vmem>>, vector<256x128xbf16>
    %cst_14 = arith.constant dense<0.000000e+00> : vector<8x128xf32>
    %19 = tpu.matmul %17, %18, %cst_14 {dimension_numbers = #tpu.dot_dimension_numbers<[1], [0], [0], [1], [0, 0, 1, 1], [], []>} : vector<8x256xbf16>, vector<256x128xbf16>, vector<8x128xf32> -> vector<8x128xf32>
    %c0_15 = arith.constant 0 : index
    %c0_16 = arith.constant 0 : index
    %20 = vector.load %arg7[%c0_15, %c0_16] : memref<1x128xf32, #tpu.memory_space<vmem>>, vector<1x128xf32>
    %21 = vector.broadcast %20 : vector<1x128xf32> to vector<8x128xf32>
    %22 = arith.addf %19, %21 : vector<8x128xf32>
    %23 = tpu.iota {dimensions = array<i32: 1>} : vector<8x128xi32>
    %c4_i32 = arith.constant 4 : i32
    %24 = vector.broadcast %c4_i32 : i32 to vector<8x128xi32>
    %25 = arith.cmpi sge, %23, %24 : vector<8x128xi32>
    %c8_i32 = arith.constant 8 : i32
    %26 = vector.broadcast %c8_i32 : i32 to vector<8x128xi32>
    %27 = arith.cmpi slt, %23, %26 : vector<8x128xi32>
    %28 = arith.andi %25, %27 : vector<8x128xi1>
    %cst_17 = arith.constant -2.000000e+01 : f32
    %cst_18 = arith.constant 2.000000e+00 : f32
    %29 = vector.broadcast %cst_17 : f32 to vector<8x128xf32>
    %30 = arith.maximumf %29, %22 : vector<8x128xf32>
    %31 = vector.broadcast %cst_18 : f32 to vector<8x128xf32>
    %32 = arith.minimumf %31, %30 : vector<8x128xf32>
    %33 = arith.select %28, %32, %22 : vector<8x128xi1>, vector<8x128xf32>
    %c0_19 = arith.constant 0 : index
    %c0_20 = arith.constant 0 : index
    %34 = vector.load %arg8[%c0_19, %c0_20] : memref<8x128xf32, #tpu.memory_space<vmem>>, vector<8x128xf32>
    tpu.vector_store %arg8[%c0_19, %c0_20], %33 {strides = array<i32>} : memref<8x128xf32, #tpu.memory_space<vmem>>, vector<8x128xf32>,
    return
  }
  func.func @transform_0(%arg0: i32) -> (i32, i32) {
    %c0_i32 = arith.constant 0 : i32
    %c0_i32_0 = arith.constant 0 : i32
    return %arg0, %c0_i32 : i32, i32
  }
  func.func @transform_1(%arg0: i32) -> (i32, i32) {
    %c0_i32 = arith.constant 0 : i32
    %c0_i32_0 = arith.constant 0 : i32
    %c0_i32_1 = arith.constant 0 : i32
    return %c0_i32, %c0_i32_0 : i32, i32
  }
  func.func @transform_2(%arg0: i32) -> (i32, i32) {
    %c0_i32 = arith.constant 0 : i32
    %c0_i32_0 = arith.constant 0 : i32
    %c0_i32_1 = arith.constant 0 : i32
    return %c0_i32, %c0_i32_0 : i32, i32
  }
  func.func @transform_3(%arg0: i32) -> (i32, i32) {
    %c0_i32 = arith.constant 0 : i32
    %c0_i32_0 = arith.constant 0 : i32
    %c0_i32_1 = arith.constant 0 : i32
    return %c0_i32, %c0_i32_0 : i32, i32
  }
  func.func @transform_4(%arg0: i32) -> (i32, i32) {
    %c0_i32 = arith.constant 0 : i32
    %c0_i32_0 = arith.constant 0 : i32
    %c0_i32_1 = arith.constant 0 : i32
    return %c0_i32, %c0_i32_0 : i32, i32
  }
  func.func @transform_5(%arg0: i32) -> (i32, i32) {
    %c0_i32 = arith.constant 0 : i32
    %c0_i32_0 = arith.constant 0 : i32
    %c0_i32_1 = arith.constant 0 : i32
    return %c0_i32, %c0_i32_0 : i32, i32
  }
  func.func @transform_6(%arg0: i32) -> (i32, i32) {
    %c0_i32 = arith.constant 0 : i32
    %c0_i32_0 = arith.constant 0 : i32
    %c0_i32_1 = arith.constant 0 : i32
    return %c0_i32, %c0_i32_0 : i32, i32
  }
  func.func @transform_7(%arg0: i32) -> (i32, i32) {
    %c0_i32 = arith.constant 0 : i32
    %c0_i32_0 = arith.constant 0 : i32
    return %arg0, %c0_i32 : i32, i32
  }
}

</mosaic_0001>

<bundles_post_ra>
// kernel: policy_net_forward.1
= control target key start
LH: loop header
LB: loop body
LE: loop exit
PB: predicated region body
PF: predicated region fallthrough
CT: control target
= control target key end

     0   :  { %vm47_vm0 = vcmask 130048   ;;  %s1068_s1 = inlined_call_operand.vmem [shape: bf16[16,256], index: 1, kind: input, shape index: {}]   ;;  %s1069_s0 = inlined_call_operand.vmem [shape: f32[8,16], index: 0, kind: input, shape index: {}]   ;;  %s1070_s3 = inlined_call_operand.vmem [shape: bf16[256,256], index: 3, kind: input, shape index: {}]   ;;  %s1071_s5 = inlined_call_operand.vmem [shape: bf16[256,128], index: 5, kind: input, shape index: {}]   ;;  %s1072_s2 = inlined_call_operand.vmem [shape: f32[1,256], index: 2, kind: input, shape index: {}]   ;;  %s1073_s4 = inlined_call_operand.vmem [shape: f32[1,256], index: 4, kind: input, shape index: {}]   ;;  %s1074_s6 = inlined_call_operand.vmem [shape: f32[1,128], index: 6, kind: input, shape index: {}]   ;;  %s1075_s7 = inlined_call_operand.vmem [shape: f32[8,128], index: 7, kind: output, shape index: {}]  }
   0x1   :  { %v508_v0 = vld [vmem:[%s1068_s1] sm:$0xf]  ;;  %v709_v1 = vld [vmem:[%s1068_s1 + $0x4] sm:$0xf0]  ;;  %v708_v2 = vld [vmem:[%s1068_s1 + $0x4] sm:$0xf] }
   0x2   :  { %v509_v3 = vor.u32 %v709_v1, %v508_v0  ;;  %v510_v4 = vld [vmem:[%s1068_s1 + $0x8] sm:$0xf0]  ;;  %v27_v5 = vld [vmem:[%s1069_s0] sm:$0xff]  ;;  %v574_v6 = vld [vmem:[%s1070_s3 + $0x70] sm:$0xf] }
   0x3   :  { %v513_v7 = vor.u32 %v708_v2, %v510_v4  ;;  %v28_v8 = vpack.c.bf16 %v27_v5, %v27_v5  ;;  %v725_v9 = vld [vmem:[%s1070_s3 + $0x74] sm:$0xf0]  ;;  %v638_v10 = vld [vmem:[%s1070_s3 + $0xf0] sm:$0xf]  ;;  %v724_v14 = vld [vmem:[%s1070_s3 + $0x74] sm:$0xf] }
   0x4   :  { %v741_v11 = vld [vmem:[%s1070_s3 + $0xf4] sm:$0xf0]  ;;  %58 = vmatpush.bf16.msra.mxu0 %v509_v3  ;;  %v575_v12 = vor.u32 %v725_v9, %v574_v6  ;;  %v576_v15 = vld [vmem:[%s1070_s3 + $0x78] sm:$0xf0]  ;;  %v740_v16 = vld [vmem:[%s1070_s3 + $0xf4] sm:$0xf] }
   0x5   :  { %v639_v13 = vor.u32 %v741_v11, %v638_v10  ;;  %71 = vmatpush.bf16.msra.mxu1 %v513_v7  ;;  %v579_v17 = vor.u32 %v724_v14, %v576_v15  ;;  %v640_v18 = vld [vmem:[%s1070_s3 + $0xf8] sm:$0xf0]  ;;  %v566_v19 = vld [vmem:[%s1070_s3 + $0x60] sm:$0xf]  ;;  %v723_v20 = vld [vmem:[%s1070_s3 + $0x64] sm:$0xf0] }
   0x6   :  { %279 = vmatpush.bf16.msra.mxu2 %v575_v12  ;;  %v643_v21 = vor.u32 %v740_v16, %v640_v18  ;;  %v567_v22 = vor.u32 %v723_v20, %v566_v19  ;;  %v630_v23 = vld [vmem:[%s1070_s3 + $0xe0] sm:$0xf]  ;;  %v739_v24 = vld [vmem:[%s1070_s3 + $0xe4] sm:$0xf0]  ;;  %v722_v25 = vld [vmem:[%s1070_s3 + $0x64] sm:$0xf] }
   0x7   :  { %292 = vmatpush.bf16.msra.mxu3 %v639_v13  ;;  %514 = vmatmul.msk.bf16.vlgmr.msra.gmra.mxu0 %vm47_vm0, %v28_v8  ;;  %v631_v26 = vor.u32 %v739_v24, %v630_v23  ;;  %v568_v27 = vld [vmem:[%s1070_s3 + $0x68] sm:$0xf0]  ;;  %v738_v28 = vld [vmem:[%s1070_s3 + $0xe4] sm:$0xf]  ;;  %v558_v31 = vld [vmem:[%s1070_s3 + $0x50] sm:$0xf] }
   0x8   :  { %v632_v29 = vld [vmem:[%s1070_s3 + $0xe8] sm:$0xf0]  ;;  %515 = vmatmul.msk.bf16.vlgmr.msra.gmra.mxu1 %vm47_vm0, %v28_v8  ;;  %305 = vmatpush.bf16.msrb.mxu0 %v579_v17  ;;  %v571_v30 = vor.u32 %v722_v25, %v568_v27  ;;  %v721_v32 = vld [vmem:[%s1070_s3 + $0x54] sm:$0xf0]  ;;  %v622_v33 = vld [vmem:[%s1070_s3 + $0xd0] sm:$0xf] }
   0x9   :  { %318 = vmatpush.bf16.msrb.mxu1 %v643_v21  ;;  %v635_v34 = vor.u32 %v738_v28, %v632_v29  ;;  %v737_v35 = vld [vmem:[%s1070_s3 + $0xd4] sm:$0xf0]  ;;  %v720_v36 = vld [vmem:[%s1070_s3 + $0x54] sm:$0xf]  ;;  %v560_v37 = vld [vmem:[%s1070_s3 + $0x58] sm:$0xf0]  ;;  %v559_v38 = vor.u32 %v721_v32, %v558_v31 }
   0xa   :  { %280 = vmatpush.bf16.msra.mxu2 %v567_v22  ;;  %v623_v39 = vor.u32 %v737_v35, %v622_v33  ;;  %v736_v40 = vld [vmem:[%s1070_s3 + $0xd4] sm:$0xf]  ;;  %v624_v41 = vld [vmem:[%s1070_s3 + $0xd8] sm:$0xf0]  ;;  %v550_v42 = vld [vmem:[%s1070_s3 + $0x40] sm:$0xf]  ;;  %v563_v46 = vor.u32 %v720_v36, %v560_v37 }
   0xb   :  { %293 = vmatpush.bf16.msra.mxu3 %v631_v26  ;;  %v719_v43 = vld [vmem:[%s1070_s3 + $0x44] sm:$0xf0]  ;;  %v614_v44 = vld [vmem:[%s1070_s3 + $0xc0] sm:$0xf]  ;;  %v627_v47 = vor.u32 %v736_v40, %v624_v41  ;;  %v718_v48 = vld [vmem:[%s1070_s3 + $0x44] sm:$0xf] }
   0xc   :  { %v735_v45 = vld [vmem:[%s1070_s3 + $0xc4] sm:$0xf0]  ;;  %306 = vmatpush.bf16.msrb.mxu0 %v571_v30  ;;  %v552_v49 = vld [vmem:[%s1070_s3 + $0x48] sm:$0xf0]  ;;  %v551_v50 = vor.u32 %v719_v43, %v550_v42  ;;  %v734_v52 = vld [vmem:[%s1070_s3 + $0xc4] sm:$0xf] }
   0xd   :  { %319 = vmatpush.bf16.msrb.mxu1 %v635_v34  ;;  %v615_v51 = vor.u32 %v735_v45, %v614_v44  ;;  %v616_v53 = vld [vmem:[%s1070_s3 + $0xc8] sm:$0xf0]  ;;  %v542_v54 = vld [vmem:[%s1070_s3 + $0x30] sm:$0xf]  ;;  %v717_v55 = vld [vmem:[%s1070_s3 + $0x34] sm:$0xf0]  ;;  %v555_v58 = vor.u32 %v718_v48, %v552_v49 }
   0xe   :  { %281 = vmatpush.bf16.msra.mxu2 %v559_v38  ;;  %v606_v56 = vld [vmem:[%s1070_s3 + $0xb0] sm:$0xf]  ;;  %v733_v57 = vld [vmem:[%s1070_s3 + $0xb4] sm:$0xf0]  ;;  %v619_v59 = vor.u32 %v734_v52, %v616_v53  ;;  %v716_v60 = vld [vmem:[%s1070_s3 + $0x34] sm:$0xf]  ;;  %v543_v62 = vor.u32 %v717_v55, %v542_v54 }
   0xf   :  { %294 = vmatpush.bf16.msra.mxu3 %v623_v39  ;;  %v544_v61 = vld [vmem:[%s1070_s3 + $0x38] sm:$0xf0]  ;;  %v607_v63 = vor.u32 %v733_v57, %v606_v56  ;;  %v732_v0 = vld [vmem:[%s1070_s3 + $0xb4] sm:$0xf]  ;;  %v534_v2 = vld [vmem:[%s1070_s3 + $0x20] sm:$0xf] }
  0x10   :  { %307 = vmatpush.bf16.msrb.mxu0 %v563_v46  ;;  %v608_v1 = vld [vmem:[%s1070_s3 + $0xb8] sm:$0xf0]  ;;  %v715_v3 = vld [vmem:[%s1070_s3 + $0x24] sm:$0xf0]  ;;  %v598_v4 = vld [vmem:[%s1070_s3 + $0xa0] sm:$0xf]  ;;  %v547_v6 = vor.u32 %v716_v60, %v544_v61 }
  0x11   :  { %320 = vmatpush.bf16.msrb.mxu1 %v627_v47  ;;  %v731_v5 = vld [vmem:[%s1070_s3 + $0xa4] sm:$0xf0]  ;;  %v611_v7 = vor.u32 %v732_v0, %v608_v1  ;;  %v714_v8 = vld [vmem:[%s1070_s3 + $0x24] sm:$0xf]  ;;  %v536_v9 = vld [vmem:[%s1070_s3 + $0x28] sm:$0xf0]  ;;  %v535_v10 = vor.u32 %v715_v3, %v534_v2 }
  0x12   :  { %282 = vmatpush.bf16.msra.mxu2 %v551_v50  ;;  %v599_v11 = vor.u32 %v731_v5, %v598_v4  ;;  %v730_v12 = vld [vmem:[%s1070_s3 + $0xa4] sm:$0xf]  ;;  %v600_v13 = vld [vmem:[%s1070_s3 + $0xa8] sm:$0xf0]  ;;  %v539_v14 = vor.u32 %v714_v8, %v536_v9  ;;  %v526_v16 = vld [vmem:[%s1070_s3 + $0x10] sm:$0xf] }
  0x13   :  { %295 = vmatpush.bf16.msra.mxu3 %v615_v51  ;;  %v603_v15 = vor.u32 %v730_v12, %v600_v13  ;;  %v713_v17 = vld [vmem:[%s1070_s3 + $0x14] sm:$0xf0]  ;;  %v590_v18 = vld [vmem:[%s1070_s3 + $0x90] sm:$0xf]  ;;  %v712_v21 = vld [vmem:[%s1070_s3 + $0x14] sm:$0xf] }
  0x14   :  { %308 = vmatpush.bf16.msrb.mxu0 %v555_v58  ;;  %v527_v19 = vor.u32 %v713_v17, %v526_v16  ;;  %v729_v20 = vld [vmem:[%s1070_s3 + $0x94] sm:$0xf0]  ;;  %v528_v22 = vld [vmem:[%s1070_s3 + $0x18] sm:$0xf0]  ;;  %v728_v25 = vld [vmem:[%s1070_s3 + $0x94] sm:$0xf] }
  0x15   :  { %321 = vmatpush.bf16.msrb.mxu1 %v619_v59  ;;  %v591_v23 = vor.u32 %v729_v20, %v590_v18  ;;  %v531_v24 = vor.u32 %v712_v21, %v528_v22  ;;  %v592_v26 = vld [vmem:[%s1070_s3 + $0x98] sm:$0xf0]  ;;  %v518_v28 = vld [vmem:[%s1070_s3] sm:$0xf]  ;;  %v711_v29 = vld [vmem:[%s1070_s3 + $0x4] sm:$0xf0] }
  0x16   :  { %283 = vmatpush.bf16.msra.mxu2 %v543_v62  ;;  %v595_v27 = vor.u32 %v728_v25, %v592_v26  ;;  %v582_v30 = vld [vmem:[%s1070_s3 + $0x80] sm:$0xf]  ;;  %v519_v31 = vor.u32 %v711_v29, %v518_v28  ;;  %v727_v32 = vld [vmem:[%s1070_s3 + $0x84] sm:$0xf0]  ;;  %v710_v33 = vld [vmem:[%s1070_s3 + $0x4] sm:$0xf]  ;;  %v493_v25 = vlaneseq }
  0x17   :  { %296 = vmatpush.bf16.msra.mxu3 %v607_v63  ;;  %v520_v34 = vld [vmem:[%s1070_s3 + $0x8] sm:$0xf0]  ;;  %v583_v35 = vor.u32 %v727_v32, %v582_v30  ;;  %v726_v37 = vld [vmem:[%s1070_s3 + $0x84] sm:$0xf]  ;;  %v757_v40 = vld [vmem:[%s1071_s5 + $0x78] sm:$0xff] }
  0x18   :  { %309 = vmatpush.bf16.msrb.mxu0 %v547_v6  ;;  %v523_v36 = vor.u32 %v710_v33, %v520_v34  ;;  %v584_v38 = vld [vmem:[%s1070_s3 + $0x88] sm:$0xf0]  ;;  %v749_v41 = vld [vmem:[%s1071_s5 + $0x38] sm:$0xff]  ;;  %v756_v42 = vld [vmem:[%s1071_s5 + $0x70] sm:$0xff] }
  0x19   :  { %322 = vmatpush.bf16.msrb.mxu1 %v611_v7  ;;  %v587_v39 = vor.u32 %v726_v37, %v584_v38  ;;  %v748_v43 = vld [vmem:[%s1071_s5 + $0x30] sm:$0xff]  ;;  %v755_v44 = vld [vmem:[%s1071_s5 + $0x68] sm:$0xff]  ;;  %v754_v46 = vld [vmem:[%s1071_s5 + $0x60] sm:$0xff] }
  0x1a   :  { %284 = vmatpush.bf16.msra.mxu2 %v535_v10  ;;  %v747_v45 = vld [vmem:[%s1071_s5 + $0x28] sm:$0xff]  ;;  %v746_v47 = vld [vmem:[%s1071_s5 + $0x20] sm:$0xff]  ;;  %v753_v48 = vld [vmem:[%s1071_s5 + $0x58] sm:$0xff] }
  0x1b   :  { %297 = vmatpush.bf16.msra.mxu3 %v599_v11  ;;  %v31_v49 = vld [vmem:[%s1072_s2] sm:$0x3]  ;;  %v752_v50 = vld [vmem:[%s1071_s5 + $0x50] sm:$0xff]  ;;  %v745_v63 = vld [vmem:[%s1071_s5 + $0x18] sm:$0xff] }
  0x1c   :  { %310 = vmatpush.bf16.msrb.mxu0 %v539_v14  ;;  %v33_v51 = vperm.slane %v31_v49, 0  ;;  %v34_v52 = vperm.slane %v31_v49, 1  ;;  %v751_v0 = vld [vmem:[%s1071_s5 + $0x48] sm:$0xff]  ;;  %v744_v1 = vld [vmem:[%s1071_s5 + $0x10] sm:$0xff]  ;;  %v750_v2 = vld [vmem:[%s1071_s5 + $0x40] sm:$0xff] }
  0x1d   :  { %323 = vmatpush.bf16.msrb.mxu1 %v603_v15  ;;  %v743_v3 = vld [vmem:[%s1071_s5 + $0x8] sm:$0xff]  ;;  %v742_v4 = vld [vmem:[%s1071_s5] sm:$0xff] }
  0x1e   :  { %285 = vmatpush.bf16.msra.mxu2 %v527_v19  ;;  %v113_v5 = vld [vmem:[%s1073_s4] sm:$0x3] }
  0x1f   :  { %298 = vmatpush.bf16.msra.mxu3 %v591_v23  ;;  %v116_v6 = vperm.slane %v113_v5, 1  ;;  %v115_v11 = vperm.slane %v113_v5, 0  ;;  %v758_v26 = vld [vmem:[%s1074_s6] ss:$0 sm:$0xff] }
  0x20   :  { %311 = vmatpush.bf16.msrb.mxu0 %v531_v24 }
  0x21   :  { %324 = vmatpush.bf16.msrb.mxu1 %v595_v27  ;;  %v494_v27 = vand.u32 127, %v493_v25 }
  0x22   :  { %286 = vmatpush.bf16.msra.mxu2 %v519_v31 }
  0x23   :  { %299 = vmatpush.bf16.msra.mxu3 %v583_v35  ;;  %vm495_vm1 = vcmp.ge.s32.totalorder %v494_v27, 4  ;;  %vm496_vm2 = vcmp.lt.s32.totalorder %v494_v27, 8 }
  0x24   :  { %312 = vmatpush.bf16.msrb.mxu0 %v523_v36  ;;  %vm497_vm3 = vmand %vm495_vm1, %vm496_vm2 }
  0x25   :  { %325 = vmatpush.bf16.msrb.mxu1 %v587_v39 }
  0x26   :  { %467 = vmatpush.bf16.msrb.mxu2 %v749_v41 }
  0x27   :  { %480 = vmatpush.bf16.msrb.mxu3 %v757_v40 }
  0x2a   :  { %468 = vmatpush.bf16.msrb.mxu2 %v748_v43 }
  0x2b   :  { %481 = vmatpush.bf16.msrb.mxu3 %v756_v42 }
  0x2e   :  { %469 = vmatpush.bf16.msrb.mxu2 %v747_v45 }
  0x2f   :  { %482 = vmatpush.bf16.msrb.mxu3 %v755_v44 }
  0x32   :  { %470 = vmatpush.bf16.msrb.mxu2 %v746_v47 }
  0x33   :  { %483 = vmatpush.bf16.msrb.mxu3 %v754_v46 }
  0x36   :  { %471 = vmatpush.bf16.msrb.mxu2 %v745_v63 }
  0x37   :  { %484 = vmatpush.bf16.msrb.mxu3 %v753_v48 }
  0x3a   :  { %472 = vmatpush.bf16.msrb.mxu2 %v744_v1 }
  0x3b   :  { %485 = vmatpush.bf16.msrb.mxu3 %v752_v50 }
  0x3e   :  { %473 = vmatpush.bf16.msrb.mxu2 %v743_v3 }
  0x3f   :  { %486 = vmatpush.bf16.msrb.mxu3 %v751_v0 }
  0x42   :  { %474 = vmatpush.bf16.msrb.mxu2 %v742_v4 }
  0x43   :  { %487 = vmatpush.bf16.msrb.mxu3 %v750_v2 }
  0x84   :  { %v60_v53 = vpop.f32.mrf.mxu0 }
  0x85   :  { %v61_v54 = vadd.f32 %v60_v53, %v33_v51  ;;  %v73_v55 = vpop.f32.mrf.mxu1 }
  0x86   :  { %v74_v56 = vadd.f32 %v73_v55, %v34_v52 }
  0x87   :  { %v77_v57 = vmax.f32 %v61_v54, 0.0 }
  0x88   :  { %v78_v58 = vmax.f32 %v74_v56, 0.0 }
  0x89   :  { %v79_v59 = vpack.c.bf16 %v77_v57, %v77_v57 }
  0x8a   :  { %v80_v60 = vpack.c.bf16 %v78_v58, %v78_v58 }
  0x8b   :  { %287 = vmatmul.bf16.vlgmr.msra.gmra.mxu2 %v79_v59  ;;  %313 = vmatmul.bf16.vlgmr.msrb.gmra.mxu0 %v79_v59 }
  0x8c   :  { %300 = vmatmul.bf16.vlgmr.msra.gmra.mxu3 %v80_v60  ;;  %326 = vmatmul.bf16.vlgmr.msrb.gmra.mxu1 %v80_v60  ;;  %v62_v61 = vpop.f32.mrf.mxu0 }
  0x8d   :  { %v75_v62 = vpop.f32.mrf.mxu1 }
 0x108   :  { %v314_v7 = vpop.f32.mrf.mxu0 }
 0x109   :  { %v315_v8 = vadd.f32 %v314_v7, %v116_v6  ;;  %v327_v9 = vpop.f32.mrf.mxu1 }
 0x10b   :  { %v328_v10 = vadd.f32 %v327_v9, %v315_v8 }
 0x10d   :  { %v332_v12 = vmax.f32 %v328_v10, 0.0 }
 0x10e   :  { %v288_v13 = vpop.f32.mrf.mxu2 }
 0x10f   :  { %v334_v14 = vpack.c.bf16 %v332_v12, %v332_v12  ;;  %v289_v15 = vadd.f32 %v288_v13, %v115_v11  ;;  %v301_v16 = vpop.f32.mrf.mxu3 }
 0x110   :  { %v316_v17 = vpop.f32.mrf.mxu0 }
 0x111   :  { %v302_v18 = vadd.f32 %v301_v16, %v289_v15  ;;  %v329_v19 = vpop.f32.mrf.mxu1  ;;  %488 = vmatmul.bf16.vlgmr.msrb.gmra.mxu3 %v334_v14 }
 0x113   :  { %v331_v20 = vmax.f32 %v302_v18, 0.0 }
 0x115   :  { %v333_v21 = vpack.c.bf16 %v331_v20, %v331_v20 }
 0x116   :  { %v290_v22 = vpop.f32.mrf.mxu2 }
 0x117   :  { %v303_v23 = vpop.f32.mrf.mxu3  ;;  %475 = vmatmul.bf16.vlgmr.msrb.gmra.mxu2 %v333_v21 }
 0x194   :  { %v489_v24 = vpop.f32.mrf.mxu3 }
 0x19a   :  { %v476_v28 = vpop.f32.mrf.mxu2 }
 0x19b   :  { %v477_v29 = vadd.f32 %v758_v26, %v476_v28 }
 0x19c   :  { %v491_v30 = vpop.f32.mrf.mxu3 }
 0x19d   :  { %v490_v31 = vadd.f32 %v489_v24, %v477_v29 }
 0x19f   :  { %v498_v32 = vmax.f32 %v490_v31, -20.0 }
 0x1a1   :  { %v499_v33 = vmin.f32 %v498_v32, 2.0 }
 0x1a2   :  { %v478_v34 = vpop.f32.mrf.mxu2 }
 0x1a3   :  { %v500_v35 = vsel %vm497_vm3, %v499_v33, %v490_v31 }
 0x1a4   :  { %501 = vst [vmem:[%s1075_s7] sm:$0xff] %v500_v35 }

</bundles_post_ra>
